<compile_context>
chip_gen: v7x
topology: tpu7x:2x2x1
jax: 0.10.0
libtpu: 0.0.40
codegen_flags: <defaults>
</compile_context>

<pallas_src>
import numpy as np
import jax
import jax.numpy as jnp
from jax.experimental import pallas as pl
from jax.experimental.pallas import tpu as pltpu


def _round_up(n, m):
    return ((n + m - 1) // m) * m


def _build_limb_loss_fn(n_frames, n_joints, n_limbs, j_pad, f_pad):
    """Returns jitted fn(kpts_est, packed_consts) -> scalar loss.

    kpts_est:      (B, 2*n_joints, 3) with F = 2*B frames.
    packed_consts: (j_pad + 2*f_pad, L) f32:
        rows [0, J)                signed incidence (+1 child / -1 parent)
        rows [j_pad, j_pad+F)      gt limb lengths
        rows [j_pad+f_pad, ..+F)   conf * 1/(1e-5 + conf.sum())
    """
    F = int(n_frames)
    J = int(n_joints)
    L = int(n_limbs)
    JP = int(j_pad)
    FP = int(f_pad)

    def kernel(x_ref, c_ref, out_ref):
        # x_ref: (3F, J) f32, row index = coord*F + frame; joints on lanes.
        x = x_ref[...]                                    # (3F, J)
        inc = c_ref[0:J, :]                               # (J, L) signed incidence
        gt = c_ref[JP:JP + F, :]                          # (F, L) gt limb lengths
        cw = c_ref[JP + FP:JP + FP + F, :]                # (F, L) conf * inv_den

        # One MXU push: per-edge coordinate differences for every frame & coord.
        d = jnp.dot(x, inc,
                    precision=jax.lax.Precision.HIGHEST,
                    preferred_element_type=jnp.float32)   # (3F, L), edges on lanes
        d0 = d[0 * F:1 * F, :]                            # (F, L)  static slices,
        d1 = d[1 * F:2 * F, :]                            # independent -> no serial
        d2 = d[2 * F:3 * F, :]                            # accumulator chain
        le = jnp.sqrt(d0 * d0 + d1 * d1 + d2 * d2)        # (F, L), ONE sqrt slab
        r = le - gt
        out_ref[0, 0] = jnp.sum(r * r * cw)               # single final reduction

    call = pl.pallas_call(
        kernel,
        out_shape=jax.ShapeDtypeStruct((1, 1), jnp.float32),
        in_specs=[pl.BlockSpec(memory_space=pltpu.MemorySpace.VMEM),
                  pl.BlockSpec(memory_space=pltpu.MemorySpace.VMEM)],
        out_specs=pl.BlockSpec(memory_space=pltpu.MemorySpace.SMEM),
    )

    @jax.jit
    def fwd(kpts_est, packed_consts):
        # (B, 2J, 3) -> (B, 2, J, 3) -> (3, B, 2, J) -> (3F, J).
        # Frame index f = 2*b + h (GT buffers were permuted to the same order).
        # This tiny wrapper transpose replaces both the torch.cat and the
        # in-kernel sublane slicing of the previous version.
        x = kpts_est.astype(jnp.float32).reshape(F // 2, 2, J, 3)
        x = jnp.transpose(x, (3, 0, 1, 2)).reshape(3 * F, J)
        return call(x, packed_consts)[0, 0]

    return fwd


class LimbLengthHandPallas:
    """JAX/Pallas port of LimbLengthHand (norm='l2', reduce='sum')."""

    def __init__(self, handl3d, handr3d, kintree):
        # handl3d, handr3d: (B, 21, 4) arrays (x, y, z, conf)
        self.kintree = np.asarray(kintree, dtype=np.int32)            # (L, 2)
        handl3d = np.asarray(handl3d, dtype=np.float32)
        handr3d = np.asarray(handr3d, dtype=np.float32)
        B, NJ = handl3d.shape[0], handl3d.shape[1]
        L = self.kintree.shape[0]
        F = 2 * B
        self._B, self._NJ, self._L, self._F = B, NJ, L, F

        # --- reference GT buffers (torch-cat frame order m = h*B + b) ---
        kpts3d = np.concatenate([handl3d, handr3d], axis=0)           # (2B, 21, 4)
        diff = kpts3d[..., self.kintree[:, 1], :3] - kpts3d[..., self.kintree[:, 0], :3]
        self.length = np.linalg.norm(diff, axis=-1, keepdims=True).astype(np.float32)  # (2B, L, 1)
        self.conf = np.minimum(kpts3d[..., self.kintree[:, 1], -1],
                               kpts3d[..., self.kintree[:, 0], -1]).astype(np.float32)  # (2B, L)

        # --- kernel constants, precomputed once on host ---------------------
        inv_den = np.float32(1.0) / (np.float32(1e-5) + self.conf.sum(dtype=np.float32))

        # Permute gt/conf to the wrapper frame order f = 2*b + h, as 2-D slabs.
        gt_f = np.empty((F, L), np.float32)
        cw_f = np.empty((F, L), np.float32)
        for h in range(2):
            for b in range(B):
                gt_f[2 * b + h] = self.length[h * B + b, :, 0]
                cw_f[2 * b + h] = self.conf[h * B + b] * inv_den

        # Signed incidence matrix: column l has +1 at child joint, -1 at parent.
        inc = np.zeros((NJ, L), np.float32)
        for l, (j0, j1) in enumerate(self.kintree):
            inc[int(j1), l] += 1.0
            inc[int(j0), l] -= 1.0

        # Pack everything into one buffer (sections 8-sublane aligned) so the
        # kernel keeps a single constant input DMA.
        JP = _round_up(NJ, 8)
        FP = _round_up(F, 8)
        packed = np.zeros((JP + 2 * FP, L), np.float32)
        packed[0:NJ] = inc
        packed[JP:JP + F] = gt_f
        packed[JP + FP:JP + FP + F] = cw_f
        self._consts = jnp.asarray(packed)                 # lives on device

        self._fwd = _build_limb_loss_fn(F, NJ, L, JP, FP)

    def forward(self, kpts_est):
        # kpts_est: (B, 2*NJ, 3)
        if tuple(kpts_est.shape) != (self._B, 2 * self._NJ, 3):
            raise ValueError(
                f"kpts_est must have shape {(self._B, 2 * self._NJ, 3)}, "
                f"got {tuple(kpts_est.shape)} (batch size is frozen at __init__)")
        return self._fwd(kpts_est, self._consts)


def _reference_forward(kpts_est, kintree, length, conf):
    kpts_est = np.asarray(kpts_est)
    k2 = np.concatenate([kpts_est[:, :21], kpts_est[:, 21:]], axis=0)
    src = k2[:, kintree[:, 0], :]
    dst = k2[:, kintree[:, 1], :]
    le = np.linalg.norm(dst - src, axis=-1, keepdims=True)
    sq = np.sum((le - length) ** 2, axis=-1)
    return np.sum(sq * conf) / (1e-5 + conf.sum())


if __name__ == "__main__":
    key = jax.random.PRNGKey(0)
    B = 2          # frames
    NJ = 21        # joints per hand
    # standard 20-edge hand kintree
    kintree = [[0, 1], [1, 2], [2, 3], [3, 4],
               [0, 5], [5, 6], [6, 7], [7, 8],
               [0, 9], [9, 10], [10, 11], [11, 12],
               [0, 13], [13, 14], [14, 15], [15, 16],
               [0, 17], [17, 18], [18, 19], [19, 20]]

    k1, k2, k3, k4, k5 = jax.random.split(key, 5)
    handl_xyz = jax.random.normal(k1, (B, NJ, 3), dtype=jnp.float32)
    handl_c = jax.random.uniform(k2, (B, NJ, 1), dtype=jnp.float32)
    handr_xyz = jax.random.normal(k3, (B, NJ, 3), dtype=jnp.float32)
    handr_c = jax.random.uniform(k4, (B, NJ, 1), dtype=jnp.float32)
    handl3d = np.asarray(jnp.concatenate([handl_xyz, handl_c], axis=-1))   # (B, 21, 4)
    handr3d = np.asarray(jnp.concatenate([handr_xyz, handr_c], axis=-1))   # (B, 21, 4)

    kpts_est = jax.random.normal(k5, (B, 2 * NJ, 3), dtype=jnp.float32)    # (B, 42, 3)

    module = LimbLengthHandPallas(handl3d, handr3d, kintree)
    loss = module.forward(kpts_est)
    loss = jax.block_until_ready(loss)

    ref = _reference_forward(kpts_est, module.kintree, module.length, module.conf)
    np.testing.assert_allclose(np.asarray(loss), np.asarray(ref), rtol=1e-4, atol=1e-6)

    print("KERNEL_OK")
</pallas_src>

<mosaic_0001>
module attributes {stable_mosaic.version = 11 : i64} {
  func.func @kernel(%arg0: memref<12x21xf32, #tpu.memory_space<vmem>>, %arg1: memref<40x20xf32, #tpu.memory_space<vmem>>, %arg2: memref<1x1xf32, #tpu.memory_space<smem>>) attributes {dimension_semantics = [], scalar_prefetch = 0 : i64, scratch_operands = 0 : i64, tpu.core_type = #tpu.core_type<tc>} {
    %c0 = arith.constant 0 : index
    %c0_0 = arith.constant 0 : index
    %0 = vector.load %arg0[%c0, %c0_0] : memref<12x21xf32, #tpu.memory_space<vmem>>, vector<12x21xf32>
    %c0_1 = arith.constant 0 : index
    %c0_2 = arith.constant 0 : index
    %1 = vector.load %arg1[%c0_1, %c0_2] : memref<40x20xf32, #tpu.memory_space<vmem>>, vector<21x20xf32>
    %c24 = arith.constant 24 : index
    %c0_3 = arith.constant 0 : index
    %2 = vector.load %arg1[%c24, %c0_3] : memref<40x20xf32, #tpu.memory_space<vmem>>, vector<4x20xf32>
    %c32 = arith.constant 32 : index
    %c0_4 = arith.constant 0 : index
    %3 = vector.load %arg1[%c32, %c0_4] : memref<40x20xf32, #tpu.memory_space<vmem>>, vector<4x20xf32>
    %cst = arith.constant dense<0.000000e+00> : vector<12x20xf32>
    %4 = tpu.matmul %0, %1, %cst {dimension_numbers = #tpu.dot_dimension_numbers<[1], [0], [0], [1], [0, 0, 1, 1], [], []>, precision = #tpu.contract_precision<fp32>} : vector<12x21xf32>, vector<21x20xf32>, vector<12x20xf32> -> vector<12x20xf32>
    %5 = vector.extract_strided_slice %4 {offsets = [0, 0], sizes = [4, 20], strides = [1, 1]} : vector<12x20xf32> to vector<4x20xf32>
    %6 = vector.extract_strided_slice %4 {offsets = [4, 0], sizes = [4, 20], strides = [1, 1]} : vector<12x20xf32> to vector<4x20xf32>
    %7 = vector.extract_strided_slice %4 {offsets = [8, 0], sizes = [4, 20], strides = [1, 1]} : vector<12x20xf32> to vector<4x20xf32>
    %8 = arith.mulf %5, %5 : vector<4x20xf32>
    %9 = arith.mulf %6, %6 : vector<4x20xf32>
    %10 = arith.addf %8, %9 : vector<4x20xf32>
    %11 = arith.mulf %7, %7 : vector<4x20xf32>
    %12 = arith.addf %10, %11 : vector<4x20xf32>
    %13 = math.sqrt %12 : vector<4x20xf32>
    %14 = arith.subf %13, %2 : vector<4x20xf32>
    %15 = arith.mulf %14, %14 : vector<4x20xf32>
    %16 = arith.mulf %15, %3 : vector<4x20xf32>
    %17 = vector.shape_cast %16 : vector<4x20xf32> to vector<1x4x20xf32>
    %cst_5 = arith.constant dense<0.000000e+00> : vector<1xf32>
    %18 = vector.multi_reduction <add>, %17, %cst_5 [1, 2] : vector<1x4x20xf32> to vector<1xf32>
    %19 = vector.shape_cast %18 : vector<1xf32> to vector<1x1x1xf32>
    %20 = vector.extract %19[0, 0, 0] : f32 from vector<1x1x1xf32>
    %c0_6 = arith.constant 0 : index
    %c0_7 = arith.constant 0 : index
    %21 = memref.load %arg2[%c0_6, %c0_7] : memref<1x1xf32, #tpu.memory_space<smem>>
    memref.store %20, %arg2[%c0_6, %c0_7] : memref<1x1xf32, #tpu.memory_space<smem>>
    return
  }
}

</mosaic_0001>

<bundles_post_ra>
// kernel: fwd.1
= control target key start
LH: loop header
LB: loop body
LE: loop exit
PB: predicated region body
PF: predicated region fallthrough
CT: control target
= control target key end

     0   :  { %vm26_vm0 = vcmask 1044480   ;;  %vm19_vm1 = vcmask 171008   ;;  %s772_s0 = inlined_call_operand.vmem [shape: f32[12,21], index: 0, kind: input, shape index: {}]   ;;  %s773_s1 = inlined_call_operand.vmem [shape: f32[40,20], index: 1, kind: input, shape index: {}]   ;;  %s774_s2 = inlined_call_operand.hbm [shape: f32[1,1], index: 2, kind: output, shape index: {}]  }
   0x1   :  { %v14_v0 = vld [vmem:[%s773_s1] sm:$0xff]  ;;  %v15_v1 = vld [vmem:[%s773_s1 + $0x8] sm:$0xff]  ;;  %v16_v2 = vld [vmem:[%s773_s1 + $0x10] sm:$0x1f] }
   0x2   :  { %v31_v3 = vand.u32 4294901760, %v14_v0  ;;  %v34_v4 = vand.u32 4294901760, %v15_v1  ;;  %v28_v5 = vsel %vm26_vm0, %v16_v2, 0  ;;  %v12_v6 = vld [vmem:[%s772_s0] sm:$0xff]  ;;  %v13_v7 = vld [vmem:[%s772_s0 + $0x8] sm:$0xf] }
   0x3   :  { %v37_v8 = vand.u32 4294901760, %v28_v5  ;;  %v21_v9 = vsel %vm19_vm1, %v12_v6, 0  ;;  %v24_v10 = vsel %vm19_vm1, %v13_v7, 0 }
   0x4   :  { %7 = vsyncpa [#allocation3], 0  ;;  %v672_v11 = vpack.c.bf16 %v34_v4, %v31_v3  ;;  %v98_v12 = vand.u32 4294901760, %v21_v9  ;;  %v108_v13 = vand.u32 4294901760, %v24_v10  ;;  %v120_v14 = vsub.f32 %v14_v0, %v31_v3  ;;  %v17_v50 = vld [vmem:[%s773_s1 + $0x18] sm:$0xf] }
   0x5   :  { %v127_v15 = vsub.f32 %v15_v1, %v34_v4  ;;  %v134_v16 = vsub.f32 %v28_v5, %v37_v8  ;;  %v18_v55 = vld [vmem:[%s773_s1 + $0x20] sm:$0xf]  ;;  %vm562_vm4 = vcmask 158720   ;;  %s711_s25 = scalar_lea.hbm %s774_s2, 16 }
   0x6   :  { %685 = vmatprep.subr.bf16.mxu0 %v672_v11  ;;  %673 = vmatprep.subr.bf16.mxu1 %v672_v11  ;;  %v99_v17 = vsub.f32 %v21_v9, %v98_v12  ;;  %v109_v18 = vsub.f32 %v24_v10, %v108_v13  ;;  %v121_v19 = vand.u32 4294901760, %v120_v14  ;;  %p712_p0 = scmp.ne.s32.totalorder %s774_s2, %s711_s25  ;;  %p715_p1 = scmp.lt.u32.totalorder %s711_s25, %s774_s2 }
   0x7   :  { %687 = vmatpush3.bf16.msra.mxu0 %v672_v11  ;;  %675 = vmatpush3.bf16.msra.mxu1 %v672_v11  ;;  %v128_v20 = vand.u32 4294901760, %v127_v15  ;;  %v135_v21 = vand.u32 4294901760, %v134_v16  ;;  %v680_v36 = vpack.c.bf16 %v127_v15, %v120_v14 }
   0x8   :  { %649 = vmatprep.subr.mxu0 %v37_v8  ;;  %v100_v22 = vand.u32 4294901760, %v99_v17  ;;  %622 = vmatprep.subr.mxu1 %v37_v8  ;;  %v110_v23 = vand.u32 4294901760, %v109_v18  ;;  %v122_v24 = vsub.f32 %v120_v14, %v121_v19  ;;  %p717_p2 = pnand %p715_p1, %p712_p0 }
   0x9   :  { %v129_v25 = vsub.f32 %v127_v15, %v128_v20  ;;  %v688_v26 = vpack.c.bf16 %v128_v20, %v121_v19  ;;  %v136_v27 = vsub.f32 %v134_v16, %v135_v21 }
   0xa   :  { %651 = vmatprep.mubr.f32.mxu0 %v100_v22  ;;  %v101_v28 = vsub.f32 %v99_v17, %v100_v22  ;;  %v111_v29 = vsub.f32 %v109_v18, %v110_v23  ;;  %v123_v30 = vand.u32 4294901760, %v122_v24 }
   0xb   :  { %650 = vmatpush3.msra.mxu0 %v37_v8  ;;  %623 = vmatpush3.msra.mxu1 %v37_v8  ;;  %v130_v31 = vand.u32 4294901760, %v129_v25  ;;  %v137_v35 = vand.u32 4294901760, %v136_v27 }
   0xc   :  { %652 = vmatmul.mubr.f32.vlgmr.msra.gmra.mrb[0].mxu0 %v110_v23  ;;  %v102_v32 = vand.u32 4294901760, %v101_v28  ;;  %v112_v33 = vand.u32 4294901760, %v111_v29  ;;  %689 = vmatprep.subr.bf16.mxu0 %v688_v26 }
   0xd   :  { %v676_v34 = vpack.c.bf16 %v130_v31, %v123_v30  ;;  %691 = vmatpush3.bf16.msra.mxu0 %v688_v26  ;;  %660 = vmatprep.mubr.f32.mxu0 %v98_v12 }
   0xe   :  { %624 = vmatprep.mubr.f32.mxu1 %v102_v32  ;;  %658 = vmatprep.subr.mxu0 %v135_v21 }
   0xf   :  { %625 = vmatmul.mubr.f32.vlgmr.msra.gmra.mrb[0].mxu1 %v112_v33  ;;  %677 = vmatprep.subr.bf16.mxu1 %v676_v34 }
  0x10   :  { %679 = vmatpush3.bf16.msra.mxu1 %v676_v34  ;;  %633 = vmatprep.mubr.f32.mxu1 %v98_v12 }
  0x11   :  { %631 = vmatprep.subr.mxu1 %v137_v35  ;;  %659 = vmatpush3.msra.mxu0 %v135_v21 }
  0x12   :  { %693 = vmatprep.subr.bf16.mxu0 %v672_v11 }
  0x14   :  { %632 = vmatpush3.msra.mxu1 %v137_v35  ;;  %661 = vmatmul.mubr.f32.vlgmr.msra.gmra.mrb[0].mxu0 %v108_v13 }
  0x15   :  { %681 = vmatprep.subr.bf16.mxu1 %v680_v36  ;;  %695 = vmatpush3.bf16.msra.mxu0 %v672_v11 }
  0x16   :  { %667 = vmatprep.subr.mxu0 %v37_v8  ;;  %669 = vmatprep.mubr.f32.mxu0 %v98_v12 }
  0x17   :  { %634 = vmatmul.mubr.f32.vlgmr.msra.gmra.mrb[0].mxu1 %v108_v13 }
  0x18   :  { %683 = vmatpush3.bf16.msra.mxu1 %v680_v36  ;;  %642 = vmatprep.mubr.f32.mxu1 %v99_v17 }
  0x19   :  { %640 = vmatprep.subr.mxu1 %v134_v16  ;;  %668 = vmatpush3.msra.mxu0 %v37_v8 }
  0x1c   :  { %641 = vmatpush3.msra.mxu1 %v134_v16  ;;  %670 = vmatmul.mubr.f32.vlgmr.msra.gmra.mrb[0].mxu0 %v108_v13 }
  0x1f   :  { %643 = vmatmul.mubr.f32.vlgmr.msra.gmra.mrb[0].mxu1 %v109_v18 }
  0xef   :  { %v671_v37 = vpop.f32.mrb[0].mxu0 }
  0xf0   :  { %v535_v38 = vpop.f32.mrb[1].mxu0 }
  0xf2   :  { %v644_v39 = vpop.f32.mrb[0].mxu1 }
  0xf3   :  { %v696_v40 = vadd.f32 %v671_v37, %v644_v39  ;;  %v284_v41 = vpop.f32.mrb[1].mxu1 }
  0xf4   :  { %v697_v42 = vadd.f32 %v535_v38, %v284_v41 }
  0xf5   :  { %v550_v45 = vmul.f32 %v696_v40, %v696_v40 }
  0xf6   :  { %v545_v43 = vmul.f32 %v697_v42, %v697_v42 }
  0xf8   :  { %v547_v44 = vrot.slane %v545_v43, 4 }
  0xfa   :  { %v549_v46 = vadd.f32 %v547_v44, %v545_v43 }
  0xfc   :  { %v551_v47 = vadd.f32 %v550_v45, %v549_v46 }
  0xfe   :  { %709 = vrsqrt.f32 %v551_v47  ;;  %vm554_vm2 = vcmp.eq.f32.partialorder %v551_v47, inf  ;;  %v557_v51 = vand.u32 2147483648, %v551_v47  ;;  %vm556_vm3 = vcmp.eq.f32.partialorder %v551_v47, 0.0 }
 0x108   :  { %v710_v48 = vpop.eup %709 }
 0x109   :  { %v553_v49 = vmul.f32 %v710_v48, %v551_v47 }
 0x10b   :  { %v555_v52 = vsel %vm554_vm2, %v551_v47, %v553_v49 }
 0x10c   :  { %v558_v53 = vsel %vm556_vm3, %v557_v51, %v555_v52 }
 0x10d   :  { %v559_v54 = vsub.f32 %v558_v53, %v17_v50 }
 0x10f   :  { %v560_v56 = vmul.f32 %v559_v54, %v559_v54 }
 0x111   :  { %v561_v57 = vmul.f32 %v560_v56, %v18_v55 }
 0x113   :  { %v563_v58 = vsel %vm562_vm4, %v561_v57, 0.0 }
 0x114   :  { %564 = vadd.xlane.f32.xlu0 %v563_v58 }
 0x1a1   :  { %v565_v59 = vpop.xlane.xlu0 %564 }
 0x1a2   :  { %v566_v60 = vrot.slane %v565_v59, 4 }
 0x1a4   :  { %v567_v61 = vadd.f32 %v566_v60, %v565_v59 }
 0x1a6   :  { %v568_v62 = vrot.slane %v567_v61, 2 }
 0x1a8   :  { %v569_v63 = vadd.f32 %v568_v62, %v567_v61 }
 0x1aa   :  { %v570_v0 = vrot.slane %v569_v63, 1 }
 0x1ac   :  { %v571_v1 = vadd.f32 %v570_v0, %v569_v63 }
 0x1ae   :  { %706 = vpush %v571_v1 }
 0x1df   :  { %s707_s22 = spop %706 }
 0x1e0   :  { %574 = sst [smem:[#allocation2]] %s707_s22 }
 0x1e1   :  { %720 = shalt.err (!%p717_p2)
}
 0x1e2   :  { %s723_s29 = smov [#allocation2]  }
 0x1e3   :  { %582 = dma.smem_to_hbm %s723_s29, 16, %s774_s2, [#allocation3]  }
 0x1e4   :  { %721 = dma.done.wait [#allocation3], 16  }
 0x1e5   :  { %722 = vsyncadd [#allocation3], 4294967280 }
 0x1e6   :  { %586 = sfence }
 0x1e7   :  { %587 = vsyncpa [#allocation3], 1 }

</bundles_post_ra>
